<compile_context>
chip_gen: v6e
topology: v6e:2x2x1
jax: 0.10.0
libtpu: 0.0.40
codegen_flags: <defaults>
</compile_context>

<pallas_src>
import jax
import jax.numpy as jnp
from jax.experimental import pallas as pl
from jax.experimental.pallas import tpu as pltpu

MAX_NORM = 0.25
SUBLANE = 8     # vreg sublane count (second-to-last dim)


def _round_up(n, m):
    return ((n + m - 1) // m) * m


def _dense_classifier_kernel(x_ref, w_ref, o_ref):
    # x_ref: [TB, D] f32  (streamed over B, auto double-buffered)
    # w_ref: [D, C]  f32  (pre-scaled + pre-transposed; VMEM-resident, single-buffered)
    # o_ref: [TB, C] f32
    o_ref[...] = jnp.dot(
        x_ref[...], w_ref[...], preferred_element_type=jnp.float32
    ).astype(o_ref.dtype)


def dense_classifier(x, weight, *, max_norm=MAX_NORM, block_b=1024):
    """DenseClassifier forward.

    x:      [B, D]  (batch, latent_dim)
    weight: [C, D]  (classes, latent_dim)
    returns [B, C] float32 = x @ renorm(weight, p=2, dim=0, maxnorm=max_norm).T
    """
    B, D = x.shape
    C, D2 = weight.shape
    assert D == D2, "latent_dim mismatch"

    x = x.astype(jnp.float32)
    w = weight.astype(jnp.float32)

    # torch.renorm(W, p=2, dim=0, maxnorm): per-output-row L2 clip.  Weight-only
    # property -> fold into W once here (one-time XLA op, exact torch ordering).
    row_norm = jnp.sqrt(jnp.sum(w * w, axis=1, keepdims=True))            # [C, 1]
    scale = jnp.where(row_norm > max_norm, max_norm / (row_norm + 1e-7), 1.0)
    w_t = (w * scale).T                                                    # [D, C]

    # ---- B tiling (sublane-aligned; layout plumbing only). ----
    TB = min(block_b, _round_up(B, SUBLANE))
    if B > 2 * SUBLANE:
        # Keep >= 2 grid steps so the "parallel" axis shards across v7x's 2 TCs.
        TB = min(TB, _round_up(-(-B // 2), SUBLANE))
    Bp = _round_up(B, TB)

    # Skip the padding copy when it's a no-op (avoids an extra HBM pass over x).
    x_in = x if Bp == B else jnp.zeros((Bp, D), jnp.float32).at[:B, :].set(x)

    # Explicit VMEM budget: 2 x-buffers + 2 out-buffers + 1 resident W (+ slack).
    itemsize = 4
    vmem_bytes = (2 * TB * D + 2 * TB * C + D * C) * itemsize
    vmem_limit = int(min(max(8 * vmem_bytes, 16 << 20), 64 << 20))

    out = pl.pallas_call(
        _dense_classifier_kernel,
        out_shape=jax.ShapeDtypeStruct((Bp, C), jnp.float32),
        grid_spec=pltpu.PrefetchScalarGridSpec(
            num_scalar_prefetch=0,
            grid=(Bp // TB,),
            in_specs=[
                # x: tiled over B, auto double-buffered by BlockSpec pipelining.
                pl.BlockSpec((TB, D), lambda i: (i, 0)),
                # W: constant index_map -> VMEM-resident across all B tiles;
                # single-buffer it (never re-fetched, so 2 buffers waste VMEM).
                pl.BlockSpec((D, C), lambda i: (0, 0),
                             pipeline_mode=pl.Buffered(1)),
            ],
            # Unpadded output: last block dim equals the full array dim (legal).
            out_specs=pl.BlockSpec((TB, C), lambda i: (i, 0)),
        ),
        compiler_params=pltpu.CompilerParams(
            # B tiles are independent -> shardable across v7x's 2 TensorCores.
            dimension_semantics=("parallel",),
            vmem_limit_bytes=vmem_limit,
        ),
    )(x_in, w_t)

    return out if Bp == B else out[:B, :]


if __name__ == "__main__":
    # Small shapes consistent with the module: latent_dim=32, classes=8.
    D, C = 32, 8

    key = jax.random.PRNGKey(0)
    kx, kw, kx2 = jax.random.split(key, 3)

    # nn.Linear-style init: U(-1/sqrt(D), 1/sqrt(D)); rows exceed max_norm=0.25,
    # so the renorm branch is actually exercised.
    bound = 1.0 / (D ** 0.5)
    weight = jax.random.uniform(kw, (C, D), dtype=jnp.float32,
                                minval=-bound, maxval=bound)

    def reference(xv, wv):
        rn = jnp.sqrt(jnp.sum(wv * wv, axis=1, keepdims=True))
        s = jnp.where(rn > MAX_NORM, MAX_NORM / (rn + 1e-7), 1.0)
        return xv @ (wv * s).T

    fwd = jax.jit(dense_classifier)

    # batch = 8 (tile-aligned, no padding copy, single grid step).
    x = jax.random.normal(kx, (8, D), dtype=jnp.float32)
    y = jax.block_until_ready(fwd(x, weight))
    assert y.shape == (8, C)
    assert jnp.allclose(y, reference(x, weight), atol=1e-5, rtol=1e-5), \
        "mismatch vs reference (B=8)"

    # batch = 40: exercises the >=2-grid-step cap and the B-padding path.
    x2 = jax.random.normal(kx2, (40, D), dtype=jnp.float32)
    y2 = jax.block_until_ready(fwd(x2, weight))
    assert y2.shape == (40, C)
    assert jnp.allclose(y2, reference(x2, weight), atol=1e-5, rtol=1e-5), \
        "mismatch vs reference (B=40)"

    print("KERNEL_OK")
</pallas_src>

<mosaic_0001>
module attributes {stable_mosaic.version = 11 : i64} {
  func.func @_dense_classifier_kernel(%arg0: i32, %arg1: memref<8x32xf32, #tpu.memory_space<vmem>>, %arg2: memref<32x8xf32, #tpu.memory_space<vmem>>, %arg3: memref<8x8xf32, #tpu.memory_space<vmem>>) attributes {dimension_semantics = [#tpu.dimension_semantics<parallel>], iteration_bounds = array<i64: 1>, scalar_prefetch = 0 : i64, scratch_operands = 0 : i64, tpu.core_type = #tpu.core_type<tc>, window_params = [{transform_indices = @transform_0, window_bounds = array<i64: 8, 32>}, {pipeline_mode = #tpu.pipeline_mode<synchronous>, transform_indices = @transform_1, window_bounds = array<i64: 32, 8>}, {transform_indices = @transform_2, window_bounds = array<i64: 8, 8>}]} {
    %c0 = arith.constant 0 : index
    %c0_0 = arith.constant 0 : index
    %0 = vector.load %arg1[%c0, %c0_0] : memref<8x32xf32, #tpu.memory_space<vmem>>, vector<8x32xf32>
    %c0_1 = arith.constant 0 : index
    %c0_2 = arith.constant 0 : index
    %1 = vector.load %arg2[%c0_1, %c0_2] : memref<32x8xf32, #tpu.memory_space<vmem>>, vector<32x8xf32>
    %cst = arith.constant dense<0.000000e+00> : vector<8x8xf32>
    %2 = tpu.matmul %0, %1, %cst {dimension_numbers = #tpu.dot_dimension_numbers<[1], [0], [0], [1], [0, 0, 1, 1], [], []>} : vector<8x32xf32>, vector<32x8xf32>, vector<8x8xf32> -> vector<8x8xf32>
    %c0_3 = arith.constant 0 : index
    %c0_4 = arith.constant 0 : index
    %3 = vector.load %arg3[%c0_3, %c0_4] : memref<8x8xf32, #tpu.memory_space<vmem>>, vector<8x8xf32>
    tpu.vector_store %arg3[%c0_3, %c0_4], %2 {strides = array<i32>} : memref<8x8xf32, #tpu.memory_space<vmem>>, vector<8x8xf32>,
    return
  }
  func.func @transform_0(%arg0: i32) -> (i32, i32) {
    %c0_i32 = arith.constant 0 : i32
    %c0_i32_0 = arith.constant 0 : i32
    return %arg0, %c0_i32 : i32, i32
  }
  func.func @transform_1(%arg0: i32) -> (i32, i32) {
    %c0_i32 = arith.constant 0 : i32
    %c0_i32_0 = arith.constant 0 : i32
    %c0_i32_1 = arith.constant 0 : i32
    return %c0_i32, %c0_i32_0 : i32, i32
  }
  func.func @transform_2(%arg0: i32) -> (i32, i32) {
    %c0_i32 = arith.constant 0 : i32
    %c0_i32_0 = arith.constant 0 : i32
    return %arg0, %c0_i32 : i32, i32
  }
}

</mosaic_0001>

<bundles_post_ra>
// kernel: dense_classifier.1
= control target key start
LH: loop header
LB: loop body
LE: loop exit
PB: predicated region body
PF: predicated region fallthrough
CT: control target
= control target key end

     0   :  { %v149_v1 = vmov 0.0   ;;  %vm150_vm0 = vmmov 0   ;;  %s185_s0 = inlined_call_operand.vmem [shape: f32[8,32], index: 0, kind: input, shape index: {}]   ;;  %s186_s1 = inlined_call_operand.vmem [shape: f32[32,8], index: 1, kind: input, shape index: {}]   ;;  %s187_s2 = inlined_call_operand.hbm [shape: f32[8,8], index: 2, kind: output, shape index: {}]  }
   0x1   :  { %v16_v0 = vld [vmem:[%s186_s1 + $0x18] sm:$0xff]  ;;  %113 = vmatprep.subr.mxu0 %v149_v1  ;;  %v15_v2 = vld [vmem:[%s186_s1 + $0x10] sm:$0xff]  ;;  %121 = vmatprep.mubr.msk.f32.mxu0 %vm150_vm0, %v149_v1 }
   0x2   :  { %7 = vsyncpa [#allocation3], 0  ;;  %114 = vmatpush3.msra.mxu0 %v16_v0  ;;  %v14_v3 = vld [vmem:[%s186_s1 + $0x8] sm:$0xff]  ;;  %v13_v4 = vld [vmem:[%s186_s1] sm:$0xff]  ;;  %vm17_vm1 = vcmask 261120   ;;  %s151_s19 = smov [#allocation2]  }
   0x3   :  { %115 = vmatprep.subr.mxu0 %v149_v1  ;;  %v12_v5 = vld [vmem:[%s185_s0] sm:$0xff]  ;;  %s99_s20 = sshll.u32 %s151_s19, 4  ;;  %vm91_vm2 = vcmask 64512   ;;  %s100_s20 = int_to_ptr.vmem [resolvable:$true] %s99_s20 }
   0x4   :  { %116 = vmatpush3.msra.mxu0 %v15_v2  ;;  %s127_s21 = scalar_lea.vmem %s100_s20, 128  ;;  %p132_p1 = scmp.lt.s32.totalorder %s100_s20, %s100_s20 }
   0x5   :  { %117 = vmatprep.subr.mxu0 %v149_v1  ;;  %p128_p0 = scmp.ne.s32.totalorder %s100_s20, %s127_s21  ;;  %p133_p2 = scmp.lt.s32.totalorder %s127_s21, %s127_s21 }
   0x6   :  { %118 = vmatpush3.msra.mxu0 %v14_v3 }
   0x7   :  { %119 = vmatprep.subr.mxu0 %v149_v1  ;;  %p134_p3 = por %p133_p2, %p132_p1 }
   0x8   :  { %120 = vmatpush3.msra.mxu0 %v13_v4 }
   0x9   :  { %122 = vmatmul.mubr.msk.f32.vlgmr.msra.gmra.mxu0 %vm17_vm1, %v12_v5  ;;  %p135_p4 = pnand %p134_p3, %p128_p0 }
  0xc9   :  { %v87_v6 = vpop.f32.mrf.mxu0 }
  0xca   :  { %92 = vst.msk [vmem:[#allocation2] sm:$0xff] %vm91_vm2, %v87_v6 }
  0xcb   :  { %v123_v7 = vpop.f32.mrf.mxu0 }
  0xcc   :  { %138 = shalt.err (!%p135_p4)
}
  0xcd   :  { %102 = dma.vmem_to_hbm [thread:$0]  %s100_s20, 128, %s187_s2, [#allocation3]  }
  0xce   :  { %147 = dma.done.wait [#allocation3], 128  }
  0xcf   :  { %148 = vsyncadd [#allocation3], 4294967168 }
  0xd0   :  { %106 = vsyncpa [#allocation3], 1 }

</bundles_post_ra>
